<compile_context>
chip_gen: v7x
topology: tpu7x:2x2x1
jax: 0.10.0
libtpu: 0.0.40
codegen_flags: <defaults>
</compile_context>

<pallas_src>
import functools

import jax
import jax.numpy as jnp
from jax.experimental import pallas as pl
from jax.experimental.pallas import tpu as pltpu


def _residual_kernel(x_ref, w_ref, gamma_ref, beta_ref, y_ref, *, eps):
    # All operands are small enough to live fully in VMEM (no grid).
    x = x_ref[...].astype(jnp.float32)                       # (B, I)
    w = w_ref[...].astype(jnp.float32)                       # (O, I)

    # ---- Linear (bias omitted: exactly cancelled by BN mean subtraction) ----
    # Contract on I without transposing w: (B, I) x (O, I) -> (B, O) on the MXU.
    h = jax.lax.dot_general(
        x, w,
        dimension_numbers=(((1,), (1,)), ((), ())),
        preferred_element_type=jnp.float32,
    )                                                        # (B, O)

    # ---- BatchNorm1d (training mode: batch stats, biased variance) ----
    mean = jnp.mean(h, axis=0, keepdims=True)                # (1, O)
    centered = h - mean
    var = jnp.mean(centered * centered, axis=0, keepdims=True)
    y = centered * jax.lax.rsqrt(var + eps)
    y = gamma_ref[...] * y + beta_ref[...]

    # ---- ReLU + lane-dense aligned store ----
    y_ref[...] = jnp.maximum(y, 0.0).astype(y_ref.dtype)


def residual_forward(x, w, b, gamma, beta, *, eps=1e-5):
    """x: (B, I); w: (O, I); b, gamma, beta: (O,). Returns (B, O + I).

    `b` is accepted for API parity with nn.Linear but is NOT used: a bias
    followed by training-mode BatchNorm has no effect on the output.
    """
    del b
    batch, in_dim = x.shape
    out_dim = w.shape[0]

    g2 = gamma.reshape(1, out_dim)
    be2 = beta.reshape(1, out_dim)

    kernel = functools.partial(_residual_kernel, eps=eps)
    vmem_spec = pl.BlockSpec(memory_space=pltpu.MemorySpace.VMEM)

    y = pl.pallas_call(
        kernel,
        out_shape=jax.ShapeDtypeStruct((batch, out_dim), x.dtype),
        in_specs=[vmem_spec] * 4,
        out_specs=vmem_spec,
    )(x, w, g2, be2)

    # Residual concat done on the original x outside the kernel (avoids the
    # unaligned masked vst path and the pointless VMEM->HBM writeback of x).
    return jnp.concatenate([y, x.astype(y.dtype)], axis=1)


def _reference(x, w, b, gamma, beta, eps=1e-5):
    # Reference keeps the bias to prove the in-kernel cancellation is exact.
    h = x @ w.T + b
    mean = h.mean(axis=0, keepdims=True)
    var = ((h - mean) ** 2).mean(axis=0, keepdims=True)
    y = gamma * (h - mean) / jnp.sqrt(var + eps) + beta
    y = jnp.maximum(y, 0.0)
    return jnp.concatenate([y, x], axis=1)


if __name__ == "__main__":
    key = jax.random.PRNGKey(0)
    k_x, k_w, k_b = jax.random.split(key, 3)

    batch, in_dim, out_dim = 8, 16, 32

    x = jax.random.normal(k_x, (batch, in_dim), dtype=jnp.float32)

    # Deterministic parameter init (mimics nn.Linear's uniform(-1/sqrt(i), 1/sqrt(i))).
    bound = 1.0 / jnp.sqrt(jnp.float32(in_dim))
    w = jax.random.uniform(k_w, (out_dim, in_dim), jnp.float32, -bound, bound)
    b = jax.random.uniform(k_b, (out_dim,), jnp.float32, -bound, bound)
    gamma = jnp.ones((out_dim,), jnp.float32)   # BatchNorm1d default weight
    beta = jnp.zeros((out_dim,), jnp.float32)   # BatchNorm1d default bias

    out = residual_forward(x, w, b, gamma, beta)
    out = jax.block_until_ready(out)

    ref = _reference(x, w, b, gamma, beta)
    assert out.shape == (batch, out_dim + in_dim)
    assert jnp.allclose(out, ref, atol=1e-5, rtol=1e-5), "mismatch vs JAX reference"

    print("KERNEL_OK")
</pallas_src>

<mosaic_0001>
module attributes {stable_mosaic.version = 11 : i64} {
  func.func @_residual_kernel(%arg0: memref<8x16xf32, #tpu.memory_space<vmem>>, %arg1: memref<32x16xf32, #tpu.memory_space<vmem>>, %arg2: memref<1x32xf32, #tpu.memory_space<vmem>>, %arg3: memref<1x32xf32, #tpu.memory_space<vmem>>, %arg4: memref<8x32xf32, #tpu.memory_space<vmem>>) attributes {dimension_semantics = [], scalar_prefetch = 0 : i64, scratch_operands = 0 : i64, tpu.core_type = #tpu.core_type<tc>} {
    %c0 = arith.constant 0 : index
    %c0_0 = arith.constant 0 : index
    %0 = vector.load %arg0[%c0, %c0_0] : memref<8x16xf32, #tpu.memory_space<vmem>>, vector<8x16xf32>
    %c0_1 = arith.constant 0 : index
    %c0_2 = arith.constant 0 : index
    %1 = vector.load %arg1[%c0_1, %c0_2] : memref<32x16xf32, #tpu.memory_space<vmem>>, vector<32x16xf32>
    %cst = arith.constant dense<0.000000e+00> : vector<8x32xf32>
    %2 = tpu.matmul %0, %1, %cst {dimension_numbers = #tpu.dot_dimension_numbers<[1], [1], [0], [0], [0, 0, 1, 0], [], []>} : vector<8x16xf32>, vector<32x16xf32>, vector<8x32xf32> -> vector<8x32xf32>
    %cst_3 = arith.constant dense<0.000000e+00> : vector<32xf32>
    %3 = vector.multi_reduction <add>, %2, %cst_3 [0] : vector<8x32xf32> to vector<32xf32>
    %4 = vector.shape_cast %3 : vector<32xf32> to vector<1x32xf32>
    %cst_4 = arith.constant 8.000000e+00 : f32
    %5 = vector.broadcast %cst_4 : f32 to vector<1x32xf32>
    %6 = arith.divf %4, %5 : vector<1x32xf32>
    %7 = vector.broadcast %6 : vector<1x32xf32> to vector<8x32xf32>
    %8 = arith.subf %2, %7 : vector<8x32xf32>
    %9 = arith.mulf %8, %8 : vector<8x32xf32>
    %cst_5 = arith.constant dense<0.000000e+00> : vector<32xf32>
    %10 = vector.multi_reduction <add>, %9, %cst_5 [0] : vector<8x32xf32> to vector<32xf32>
    %11 = vector.shape_cast %10 : vector<32xf32> to vector<1x32xf32>
    %cst_6 = arith.constant 8.000000e+00 : f32
    %12 = vector.broadcast %cst_6 : f32 to vector<1x32xf32>
    %13 = arith.divf %11, %12 : vector<1x32xf32>
    %cst_7 = arith.constant 9.99999974E-6 : f32
    %14 = vector.broadcast %cst_7 : f32 to vector<1x32xf32>
    %15 = arith.addf %13, %14 : vector<1x32xf32>
    %16 = math.rsqrt %15 : vector<1x32xf32>
    %17 = vector.broadcast %16 : vector<1x32xf32> to vector<8x32xf32>
    %18 = arith.mulf %8, %17 : vector<8x32xf32>
    %c0_8 = arith.constant 0 : index
    %c0_9 = arith.constant 0 : index
    %19 = vector.load %arg2[%c0_8, %c0_9] : memref<1x32xf32, #tpu.memory_space<vmem>>, vector<1x32xf32>
    %20 = vector.broadcast %19 : vector<1x32xf32> to vector<8x32xf32>
    %21 = arith.mulf %20, %18 : vector<8x32xf32>
    %c0_10 = arith.constant 0 : index
    %c0_11 = arith.constant 0 : index
    %22 = vector.load %arg3[%c0_10, %c0_11] : memref<1x32xf32, #tpu.memory_space<vmem>>, vector<1x32xf32>
    %23 = vector.broadcast %22 : vector<1x32xf32> to vector<8x32xf32>
    %24 = arith.addf %21, %23 : vector<8x32xf32>
    %cst_12 = arith.constant 0.000000e+00 : f32
    %25 = vector.broadcast %cst_12 : f32 to vector<8x32xf32>
    %26 = arith.maximumf %24, %25 : vector<8x32xf32>
    %c0_13 = arith.constant 0 : index
    %c0_14 = arith.constant 0 : index
    %27 = vector.load %arg4[%c0_13, %c0_14] : memref<8x32xf32, #tpu.memory_space<vmem>>, vector<8x32xf32>
    tpu.vector_store %arg4[%c0_13, %c0_14], %26 {strides = array<i32>} : memref<8x32xf32, #tpu.memory_space<vmem>>, vector<8x32xf32>,
    return
  }
}

</mosaic_0001>

<bundles_post_ra>
// kernel: tpu_custom_call.1
= control target key start
LH: loop header
LB: loop body
LE: loop exit
PB: predicated region body
PF: predicated region fallthrough
CT: control target
= control target key end

     0   :  { %vm23_vm0 = vcmask 130048   ;;  %v225_v2 = vmov 0.0|0.0   ;;  %vm226_vm2 = vmmov 0   ;;  %v227_v4 = vmov 0.0   ;;  %s293_s0 = inlined_call_operand.vmem [shape: f32[8,16], index: 0, kind: input, shape index: {}]   ;;  %s294_s1 = inlined_call_operand.vmem [shape: f32[32,16], index: 1, kind: input, shape index: {}]   ;;  %s295_s2 = inlined_call_operand.vmem [shape: f32[1,32], index: 2, kind: input, shape index: {}]   ;;  %s296_s3 = inlined_call_operand.vmem [shape: f32[1,32], index: 3, kind: input, shape index: {}]   ;;  %s297_s4 = inlined_call_operand.hbm [shape: f32[8,32], index: 4, kind: output, shape index: {}]  }
   0x1   :  { %v19_v0 = vld [vmem:[%s294_s1] sm:$0xff]  ;;  %v20_v1 = vld [vmem:[%s294_s1 + $0x8] sm:$0xff]  ;;  %187 = vmatprep.subr.bf16.mxu0 %v225_v2  ;;  %vm189_vm1 = vmpackc.low %vm23_vm0, %vm23_vm0  ;;  %184 = vmatprep.mubr.msk.f32.mxu0 %vm226_vm2, %v227_v4 }
   0x2   :  { %v188_v3 = vpack.c.bf16 %v20_v1, %v19_v0 }
   0x3   :  { %9 = vsyncpa [#allocation3], 0  ;;  %v21_v5 = vld [vmem:[%s294_s1 + $0x10] sm:$0xff]  ;;  %v22_v6 = vld [vmem:[%s294_s1 + $0x18] sm:$0xff]  ;;  %vm109_vm3 = vcmask 261120   ;;  %s228_s27 = smov [#allocation2]  }
   0x4   :  { %190 = vmatpush3.bf16.xpose.msk.msra.mxu0 %vm189_vm1, %v188_v3  ;;  %v192_v7 = vpack.c.bf16 %v22_v6, %v21_v5  ;;  %v18_v8 = vld [vmem:[%s293_s0] sm:$0xff]  ;;  %s156_s28 = sshll.u32 %s228_s27, 4  ;;  %s157_s28 = int_to_ptr.vmem [resolvable:$true] %s156_s28 }
   0x5   :  { %191 = vmatprep.subr.bf16.mxu0 %v225_v2  ;;  %v169_v31 = vld [vmem:[%s295_s2] ss:$0 sm:$0xff]  ;;  %s201_s29 = scalar_lea.vmem %s157_s28, 128  ;;  %p206_p1 = scmp.lt.s32.totalorder %s157_s28, %s157_s28 }
   0x6   :  { %v170_v33 = vld [vmem:[%s296_s3] ss:$0 sm:$0xff]  ;;  %p202_p0 = scmp.ne.s32.totalorder %s157_s28, %s201_s29  ;;  %p207_p2 = scmp.lt.s32.totalorder %s201_s29, %s201_s29 }
   0x8   :  { %p208_p3 = por %p207_p2, %p206_p1 }
   0xa   :  { %p209_p4 = pnand %p208_p3, %p202_p0 }
   0xc   :  { %194 = vmatpush3.bf16.xpose.msk.msra.mxu0 %vm189_vm1, %v192_v7 }
  0x13   :  { %185 = vmatmul.mubr.msk.f32.vlgmr.msra.gmra.mrb[0].mxu0 %vm23_vm0, %v18_v8 }
  0xe6   :  { %v105_v9 = vpop.f32.mrb[0].mxu0 }
  0xe7   :  { %v110_v10 = vsel %vm109_vm3, %v105_v9, 0.0  ;;  %v186_v11 = vpop.f32.mrb[1].mxu0 }
  0xe8   :  { %v111_v12 = vrot.slane %v110_v10, 4 }
  0xea   :  { %v112_v13 = vadd.f32 %v111_v12, %v110_v10 }
  0xec   :  { %v113_v14 = vrot.slane %v112_v13, 2 }
  0xee   :  { %v114_v15 = vadd.f32 %v113_v14, %v112_v13 }
  0xf0   :  { %v115_v16 = vrot.slane %v114_v15, 1 }
  0xf2   :  { %v116_v17 = vadd.f32 %v115_v16, %v114_v15 }
  0xf4   :  { %v118_v18 = vmul.f32 0.125, %v116_v17 }
  0xf6   :  { %v119_v19 = vsub.f32 %v105_v9, %v118_v18 }
  0xf8   :  { %v120_v20 = vmul.f32 %v119_v19, %v119_v19 }
  0xfa   :  { %v121_v21 = vsel %vm109_vm3, %v120_v20, 0.0 }
  0xfb   :  { %v122_v22 = vrot.slane %v121_v21, 4 }
  0xfd   :  { %v123_v23 = vadd.f32 %v122_v22, %v121_v21 }
  0xff   :  { %v124_v24 = vrot.slane %v123_v23, 2 }
 0x101   :  { %v125_v25 = vadd.f32 %v124_v24, %v123_v23 }
 0x103   :  { %v126_v26 = vrot.slane %v125_v25, 1 }
 0x105   :  { %v127_v27 = vadd.f32 %v126_v26, %v125_v25 }
 0x107   :  { %v128_v28 = vmul.f32 0.125, %v127_v27 }
 0x109   :  { %v129_v29 = vadd.f32 1e-05, %v128_v28 }
 0x10b   :  { %199 = vrsqrt.f32 %v129_v29 }
 0x115   :  { %v200_v30 = vpop.eup %199 }
 0x116   :  { %v131_v32 = vmul.f32 %v200_v30, %v119_v19 }
 0x118   :  { %v139_v34 = vmul.f32 %v169_v31, %v131_v32 }
 0x11a   :  { %v147_v35 = vadd.f32 %v170_v33, %v139_v34 }
 0x11c   :  { %v148_v36 = vmax.f32 %v147_v35, 0.0 }
 0x11e   :  { %149 = vst.msk [vmem:[#allocation2] sm:$0xff] %vm109_vm3, %v148_v36 }
 0x11f   :  { %212 = shalt.err (!%p209_p4)
}
 0x120   :  { %s213_s5 = scalar_lea.hbm %s297_s4, 128 }
 0x121   :  { %p214_p5 = scmp.ne.s32.totalorder %s297_s4, %s213_s5  ;;  %p217_p6 = scmp.lt.u32.totalorder %s213_s5, %s297_s4 }
 0x123   :  { %p219_p7 = pnand %p217_p6, %p214_p5 }
 0x125   :  { %222 = shalt.err (!%p219_p7)
}
 0x126   :  { %159 = dma.vmem_to_hbm [thread:$0]  %s157_s28, 128, %s297_s4, [#allocation3]  }
 0x127   :  { %223 = dma.done.wait [#allocation3], 128  }
 0x128   :  { %224 = vsyncadd [#allocation3], 4294967168 }
 0x129   :  { %163 = vsyncpa [#allocation3], 1 }

</bundles_post_ra>
